<compile_context>
chip_gen: v6e
topology: v6e:2x2x1
jax: 0.10.0
libtpu: 0.0.40
codegen_flags: <defaults>
</compile_context>

<pallas_src>
import jax
import jax.numpy as jnp
from jax.experimental import pallas as pl
from jax.experimental.pallas import tpu as pltpu


def _round_up(n, m):
    return ((n + m - 1) // m) * m


def _tool_calling_kernel(x_ref, w_fs1_ref, b_fs1_ref, w_fs2_ref, b_fs2_ref,
                         w_gate_ref, b_gate_ref, probs_ref, gate_ref):
    x = x_ref[...]                                        # [TM, H] f32

    # tool_gate: 1-wide Linear done on VPU (multiply) + XLU (row reduce) so the MXU
    # matmul below stays an exact [H, TH] tile and no padded lanes are written.
    gate_logit = jnp.sum(x * w_gate_ref[...], axis=-1, keepdims=True)   # [TM, 1] f32
    gate_logit = gate_logit + b_gate_ref[0]
    # compact lane-friendly store: token i -> gate[i // 8, i % 8]
    gate_ref[...] = gate_logit.reshape(gate_ref.shape)

    # function_selector: Linear(H->TH) -> ReLU -> Dropout(identity in eval) -> Linear(TH->MT)
    x_bf = x.astype(jnp.bfloat16)                         # cast in-kernel (no wrapper pass)
    h1 = (jnp.dot(x_bf, w_fs1_ref[...], preferred_element_type=jnp.float32)
          + b_fs1_ref[...])                               # [TM, TH] f32
    h1 = jnp.maximum(h1, 0.0).astype(jnp.bfloat16)
    logits = (jnp.dot(h1, w_fs2_ref[...], preferred_element_type=jnp.float32)
              + b_fs2_ref[...])                           # [TM, MT] f32

    # softmax over the tool dimension (reciprocal-multiply, no per-element divide)
    m = jnp.max(logits, axis=-1, keepdims=True)
    e = jnp.exp(logits - m)
    inv = pl.reciprocal(jnp.sum(e, axis=-1, keepdims=True), approx=False)
    probs_ref[...] = e * inv


def init_params(key, hidden_size, tool_hidden_dim, max_tools, tool_embedding_dim):
    """Deterministic synthetic parameters (shapes mirror the PyTorch module).
    Linear weights stored as [in_features, out_features]."""
    ks = jax.random.split(key, 6)
    s = 0.02
    f32 = jnp.float32
    return {
        # nn.Embedding(max_tools, tool_embedding_dim) — only used by the host-side
        # tool loop; kept for shape fidelity.
        "tool_embeddings": jax.random.normal(ks[0], (max_tools, tool_embedding_dim), f32),
        "w_fs1": s * jax.random.normal(ks[1], (hidden_size, tool_hidden_dim), f32),
        "b_fs1": jnp.zeros((1, tool_hidden_dim), f32),
        "w_fs2": s * jax.random.normal(ks[2], (tool_hidden_dim, max_tools), f32),
        "b_fs2": jnp.zeros((1, max_tools), f32),
        "w_gate": s * jax.random.normal(ks[3], (hidden_size, 1), f32),
        "b_gate": jnp.zeros((1, 1), f32),
    }


def prepare_params(params):
    """One-time kernel-ready weight prep (bf16 cast, gate-row layout). Call once at init."""
    return {
        "w_fs1": params["w_fs1"].astype(jnp.bfloat16),          # [H, TH]
        "b_fs1": params["b_fs1"].astype(jnp.float32),            # [1, TH]
        "w_fs2": params["w_fs2"].astype(jnp.bfloat16),           # [TH, MT]
        "b_fs2": params["b_fs2"].astype(jnp.float32),             # [1, MT]
        "w_gate_row": params["w_gate"].reshape(1, -1).astype(jnp.float32),  # [1, H]
        "b_gate": params["b_gate"].reshape(1).astype(jnp.float32),          # [1]
    }


def _choose_tile(n, max_row_tile):
    if n <= 256:
        return _round_up(n, 128)                  # single grid step
    if n <= 2 * max_row_tile:
        return _round_up(-(-n // 2), 128)         # >= 2 steps so both v7x TCs get work
    return max_row_tile


def tool_calling_forward(hidden_states, prep, tool_registry=None,
                         execute_tools=False, *, max_row_tile=1024):
    """hidden_states: [B, S, H] float32 -> (enhanced_states, tool_outputs)."""
    B, S, H = hidden_states.shape
    TH = prep["w_fs1"].shape[1]
    MT = prep["w_fs2"].shape[1]
    N = B * S

    tile = _choose_tile(N, max_row_tile)          # multiple of 128
    n_pad = _round_up(N, tile)
    grid = n_pad // tile

    x = hidden_states.reshape(N, H)               # stays f32; cast happens in-kernel
    if n_pad != N:
        x = jnp.pad(x, ((0, n_pad - N), (0, 0)))

    row_spec = lambda cols: pl.BlockSpec((tile, cols), lambda i: (i, 0))
    full_spec = lambda r, c: pl.BlockSpec((r, c), lambda i: (0, 0))

    flops = 2 * n_pad * (H * TH + TH * MT + H)
    bytes_accessed = (n_pad * H * 4                                   # x (f32, read once)
                      + H * TH * 2 + TH * MT * 2                      # bf16 weights
                      + (TH + MT + H + 1) * 4                         # biases + gate row
                      + n_pad * MT * 4 + n_pad * 4)                   # probs + compact gate
    cost = pl.CostEstimate(flops=int(flops),
                           transcendentals=int(n_pad * (MT + 1)),
                           bytes_accessed=int(bytes_accessed))

    probs, gate = pl.pallas_call(
        _tool_calling_kernel,
        out_shape=[jax.ShapeDtypeStruct((n_pad, MT), jnp.float32),
                   jax.ShapeDtypeStruct((n_pad // 8, 8), jnp.float32)],
        grid_spec=pltpu.PrefetchScalarGridSpec(
            num_scalar_prefetch=0,
            grid=(grid,),
            in_specs=[row_spec(H),                                    # x
                      full_spec(H, TH), full_spec(1, TH),             # fs layer 1
                      full_spec(TH, MT), full_spec(1, MT),            # fs layer 2
                      full_spec(1, H),                                # gate weight row
                      pl.BlockSpec(memory_space=pltpu.MemorySpace.SMEM)],  # gate bias scalar
            out_specs=[row_spec(MT),
                       pl.BlockSpec((tile // 8, 8), lambda i: (i, 0))],
        ),
        compiler_params=pltpu.CompilerParams(
            dimension_semantics=("parallel",)),
        cost_estimate=cost,
    )(x, prep["w_fs1"], prep["b_fs1"], prep["w_fs2"], prep["b_fs2"],
      prep["w_gate_row"], prep["b_gate"])

    gate_logits = gate.reshape(-1)[:N].reshape(B, S, 1)
    should_call_tools = gate_logits > 0.0         # == sigmoid(logit) > 0.5

    enhanced_states = hidden_states               # pass-through: no tool results integrated
    tool_outputs = None
    if tool_registry is not None:
        # TODO(synk): the reference additionally gates this on should_call_tools.any()
        # (host-side data-dependent branch) and runs a per-token parameter_generator /
        # result_integrator / _execute_tool Python loop with a random placeholder result;
        # with execute_tools=False it has no effect on the returned tensors and is not
        # kernelized.
        tool_probs = probs[:N].reshape(B, S, MT)
        tool_outputs = {
            "tool_probs": tool_probs,
            "should_call_tools": should_call_tools,
            "tool_call_results": [],
        }
    return enhanced_states, tool_outputs


if __name__ == "__main__":
    # Small config consistent with the module: hidden_size=256, tool_hidden_dim=256,
    # max_tools=128, tool_embedding_dim=128; batch=2, seq=8.
    B, S, H = 2, 8, 256
    TOOL_HIDDEN, MAX_TOOLS, TOOL_EMB = 256, 128, 128

    key = jax.random.PRNGKey(0)
    k_x, k_p = jax.random.split(key)
    hidden_states = jax.random.normal(k_x, (B, S, H), jnp.float32)
    params = init_params(k_p, H, TOOL_HIDDEN, MAX_TOOLS, TOOL_EMB)
    prep = prepare_params(params)            # one-time weight prep (not per forward call)
    tool_registry = {f"tool_{i}": None for i in range(8)}

    enhanced_states, tool_outputs = tool_calling_forward(
        hidden_states, prep, tool_registry=tool_registry, execute_tools=False)
    jax.block_until_ready((enhanced_states,
                           tool_outputs["tool_probs"],
                           tool_outputs["should_call_tools"]))

    assert enhanced_states.shape == (B, S, H)
    assert tool_outputs["tool_probs"].shape == (B, S, MAX_TOOLS)
    assert tool_outputs["should_call_tools"].shape == (B, S, 1)
    sums = jnp.sum(tool_outputs["tool_probs"], axis=-1)
    assert bool(jnp.all(jnp.abs(sums - 1.0) < 1e-3)), "softmax rows must sum to 1"
    print("KERNEL_OK")
</pallas_src>

<mosaic_0001>
module attributes {stable_mosaic.version = 11 : i64} {
  func.func @_tool_calling_kernel(%arg0: i32, %arg1: memref<128x256xf32, #tpu.memory_space<vmem>>, %arg2: memref<256x256xbf16, #tpu.memory_space<vmem>>, %arg3: memref<1x256xf32, #tpu.memory_space<vmem>>, %arg4: memref<256x128xbf16, #tpu.memory_space<vmem>>, %arg5: memref<1x128xf32, #tpu.memory_space<vmem>>, %arg6: memref<1x256xf32, #tpu.memory_space<vmem>>, %arg7: memref<1xf32, #tpu.memory_space<smem>>, %arg8: memref<128x128xf32, #tpu.memory_space<vmem>>, %arg9: memref<16x8xf32, #tpu.memory_space<vmem>>) attributes {dimension_semantics = [#tpu.dimension_semantics<parallel>], iteration_bounds = array<i64: 1>, scalar_prefetch = 0 : i64, scratch_operands = 0 : i64, tpu.core_type = #tpu.core_type<tc>, window_params = [{transform_indices = @transform_0, window_bounds = array<i64: 128, 256>}, {pipeline_mode = #tpu.pipeline_mode<synchronous>, transform_indices = @transform_1, window_bounds = array<i64: 256, 256>}, {pipeline_mode = #tpu.pipeline_mode<synchronous>, transform_indices = @transform_2, window_bounds = array<i64: 1, 256>}, {pipeline_mode = #tpu.pipeline_mode<synchronous>, transform_indices = @transform_3, window_bounds = array<i64: 256, 128>}, {pipeline_mode = #tpu.pipeline_mode<synchronous>, transform_indices = @transform_4, window_bounds = array<i64: 1, 128>}, {pipeline_mode = #tpu.pipeline_mode<synchronous>, transform_indices = @transform_5, window_bounds = array<i64: 1, 256>}, {transform_indices = @transform_6, window_bounds = array<i64: 1>}, {transform_indices = @transform_7, window_bounds = array<i64: 128, 128>}, {transform_indices = @transform_8, window_bounds = array<i64: 16, 8>}]} {
    %c0 = arith.constant 0 : index
    %c0_0 = arith.constant 0 : index
    %0 = vector.load %arg1[%c0, %c0_0] : memref<128x256xf32, #tpu.memory_space<vmem>>, vector<128x256xf32>
    %c0_1 = arith.constant 0 : index
    %c0_2 = arith.constant 0 : index
    %1 = vector.load %arg6[%c0_1, %c0_2] : memref<1x256xf32, #tpu.memory_space<vmem>>, vector<1x256xf32>
    %2 = vector.broadcast %1 : vector<1x256xf32> to vector<128x256xf32>
    %3 = arith.mulf %0, %2 : vector<128x256xf32>
    %cst = arith.constant dense<0.000000e+00> : vector<128xf32>
    %4 = vector.multi_reduction <add>, %3, %cst [1] : vector<128x256xf32> to vector<128xf32>
    %5 = vector.shape_cast %4 : vector<128xf32> to vector<128x1xf32>
    %c0_3 = arith.constant 0 : index
    %6 = memref.load %arg7[%c0_3] : memref<1xf32, #tpu.memory_space<smem>>
    %7 = vector.broadcast %6 : f32 to vector<128x1xf32>
    %8 = arith.addf %5, %7 : vector<128x1xf32>
    %9 = vector.shape_cast %8 : vector<128x1xf32> to vector<16x8xf32>
    %c0_4 = arith.constant 0 : index
    %c0_5 = arith.constant 0 : index
    %10 = vector.load %arg9[%c0_4, %c0_5] : memref<16x8xf32, #tpu.memory_space<vmem>>, vector<16x8xf32>
    tpu.vector_store %arg9[%c0_4, %c0_5], %9 {strides = array<i32>} : memref<16x8xf32, #tpu.memory_space<vmem>>, vector<16x8xf32>,
    %11 = arith.truncf %0 : vector<128x256xf32> to vector<128x256xbf16>
    %c0_6 = arith.constant 0 : index
    %c0_7 = arith.constant 0 : index
    %12 = vector.load %arg2[%c0_6, %c0_7] : memref<256x256xbf16, #tpu.memory_space<vmem>>, vector<256x256xbf16>
    %cst_8 = arith.constant dense<0.000000e+00> : vector<128x256xf32>
    %13 = tpu.matmul %11, %12, %cst_8 {dimension_numbers = #tpu.dot_dimension_numbers<[1], [0], [0], [1], [0, 0, 1, 1], [], []>} : vector<128x256xbf16>, vector<256x256xbf16>, vector<128x256xf32> -> vector<128x256xf32>
    %c0_9 = arith.constant 0 : index
    %c0_10 = arith.constant 0 : index
    %14 = vector.load %arg3[%c0_9, %c0_10] : memref<1x256xf32, #tpu.memory_space<vmem>>, vector<1x256xf32>
    %15 = vector.broadcast %14 : vector<1x256xf32> to vector<128x256xf32>
    %16 = arith.addf %13, %15 : vector<128x256xf32>
    %cst_11 = arith.constant 0.000000e+00 : f32
    %17 = vector.broadcast %cst_11 : f32 to vector<128x256xf32>
    %18 = arith.maximumf %16, %17 : vector<128x256xf32>
    %19 = arith.truncf %18 : vector<128x256xf32> to vector<128x256xbf16>
    %c0_12 = arith.constant 0 : index
    %c0_13 = arith.constant 0 : index
    %20 = vector.load %arg4[%c0_12, %c0_13] : memref<256x128xbf16, #tpu.memory_space<vmem>>, vector<256x128xbf16>
    %cst_14 = arith.constant dense<0.000000e+00> : vector<128x128xf32>
    %21 = tpu.matmul %19, %20, %cst_14 {dimension_numbers = #tpu.dot_dimension_numbers<[1], [0], [0], [1], [0, 0, 1, 1], [], []>} : vector<128x256xbf16>, vector<256x128xbf16>, vector<128x128xf32> -> vector<128x128xf32>
    %c0_15 = arith.constant 0 : index
    %c0_16 = arith.constant 0 : index
    %22 = vector.load %arg5[%c0_15, %c0_16] : memref<1x128xf32, #tpu.memory_space<vmem>>, vector<1x128xf32>
    %23 = vector.broadcast %22 : vector<1x128xf32> to vector<128x128xf32>
    %24 = arith.addf %21, %23 : vector<128x128xf32>
    %cst_17 = arith.constant dense<0xFF800000> : vector<128xf32>
    %25 = vector.multi_reduction <maximumf>, %24, %cst_17 [1] : vector<128x128xf32> to vector<128xf32>
    %26 = vector.shape_cast %25 : vector<128xf32> to vector<128x1xf32>
    %27 = vector.broadcast %26 : vector<128x1xf32> to vector<128x128xf32>
    %28 = arith.subf %24, %27 : vector<128x128xf32>
    %29 = math.exp %28 : vector<128x128xf32>
    %cst_18 = arith.constant dense<0.000000e+00> : vector<128xf32>
    %30 = vector.multi_reduction <add>, %29, %cst_18 [1] : vector<128x128xf32> to vector<128xf32>
    %31 = vector.shape_cast %30 : vector<128xf32> to vector<128x1xf32>
    %32 = tpu.reciprocal %31 : vector<128x1xf32> -> vector<128x1xf32>
    %33 = vector.broadcast %32 : vector<128x1xf32> to vector<128x128xf32>
    %34 = arith.mulf %29, %33 : vector<128x128xf32>
    %c0_19 = arith.constant 0 : index
    %c0_20 = arith.constant 0 : index
    %35 = vector.load %arg8[%c0_19, %c0_20] : memref<128x128xf32, #tpu.memory_space<vmem>>, vector<128x128xf32>
    tpu.vector_store %arg8[%c0_19, %c0_20], %34 {strides = array<i32>} : memref<128x128xf32, #tpu.memory_space<vmem>>, vector<128x128xf32>,
    return
  }
  func.func @transform_0(%arg0: i32) -> (i32, i32) {
    %c0_i32 = arith.constant 0 : i32
    %c0_i32_0 = arith.constant 0 : i32
    return %arg0, %c0_i32 : i32, i32
  }
  func.func @transform_1(%arg0: i32) -> (i32, i32) {
    %c0_i32 = arith.constant 0 : i32
    %c0_i32_0 = arith.constant 0 : i32
    %c0_i32_1 = arith.constant 0 : i32
    return %c0_i32, %c0_i32_0 : i32, i32
  }
  func.func @transform_2(%arg0: i32) -> (i32, i32) {
    %c0_i32 = arith.constant 0 : i32
    %c0_i32_0 = arith.constant 0 : i32
    %c0_i32_1 = arith.constant 0 : i32
    return %c0_i32, %c0_i32_0 : i32, i32
  }
  func.func @transform_3(%arg0: i32) -> (i32, i32) {
    %c0_i32 = arith.constant 0 : i32
    %c0_i32_0 = arith.constant 0 : i32
    %c0_i32_1 = arith.constant 0 : i32
    return %c0_i32, %c0_i32_0 : i32, i32
  }
  func.func @transform_4(%arg0: i32) -> (i32, i32) {
    %c0_i32 = arith.constant 0 : i32
    %c0_i32_0 = arith.constant 0 : i32
    %c0_i32_1 = arith.constant 0 : i32
    return %c0_i32, %c0_i32_0 : i32, i32
  }
  func.func @transform_5(%arg0: i32) -> (i32, i32) {
    %c0_i32 = arith.constant 0 : i32
    %c0_i32_0 = arith.constant 0 : i32
    %c0_i32_1 = arith.constant 0 : i32
    return %c0_i32, %c0_i32_0 : i32, i32
  }
  func.func @transform_6(%arg0: i32) -> i32 {
    %c0_i32 = arith.constant 0 : i32
    %c0_i32_0 = arith.constant 0 : i32
    return %c0_i32 : i32
  }
  func.func @transform_7(%arg0: i32) -> (i32, i32) {
    %c0_i32 = arith.constant 0 : i32
    %c0_i32_0 = arith.constant 0 : i32
    return %arg0, %c0_i32 : i32, i32
  }
  func.func @transform_8(%arg0: i32) -> (i32, i32) {
    %c0_i32 = arith.constant 0 : i32
    %c0_i32_0 = arith.constant 0 : i32
    return %arg0, %c0_i32 : i32, i32
  }
}

</mosaic_0001>

<bundles_post_ra>
// kernel: tpu_custom_call.1
= control target key start
LH: loop header
LB: loop body
LE: loop exit
PB: predicated region body
PF: predicated region fallthrough
CT: control target
= control target key end

     0   :  { %15 = vsyncpa [#allocation4], 0  ;;  %s1970_s0 = inlined_call_operand.hbm [shape: f32[128,256], index: 0, kind: input, shape index: {}]   ;;  %s1971_s1 = inlined_call_operand.hbm [shape: bf16[256,256], index: 1, kind: input, shape index: {}]   ;;  %s1972_s2 = inlined_call_operand.vmem [shape: f32[1,256], index: 2, kind: input, shape index: {}]   ;;  %s1973_s3 = inlined_call_operand.hbm [shape: bf16[256,128], index: 3, kind: input, shape index: {}]   ;;  %s1974_s4 = inlined_call_operand.vmem [shape: f32[1,128], index: 4, kind: input, shape index: {}]   ;;  %s1975_s5 = inlined_call_operand.vmem [shape: f32[1,256], index: 5, kind: input, shape index: {}]   ;;  %s1976_s6 = inlined_call_operand.<no memory space> [shape: f32[1], index: 6, kind: input, shape index: {}]   ;;  %s1977_s7 = inlined_call_operand.hbm [shape: f32[128,128], index: 7, kind: output, shape index: {0}]   ;;  %s1978_s8 = inlined_call_operand.vmem [shape: f32[16,8], index: 8, kind: output, shape index: {1}]  }
   0x1   :  { %16 = vsyncpa [#allocation7], 0 }
   0x2   :  { %17 = vsyncpa [#allocation5], 0  ;;  %s1454_s27 = smov [#allocation6]  }
   0x3   :  { %s35_s28 = sshll.u32 %s1454_s27, 4  ;;  %s36_s28 = int_to_ptr.vmem [resolvable:$true] %s35_s28 }
   0x4   :  { %s1376_s29 = scalar_lea.vmem %s36_s28, 4096  ;;  %p1381_p1 = scmp.lt.s32.totalorder %s36_s28, %s36_s28 }
   0x5   :  { %p1377_p0 = scmp.ne.s32.totalorder %s36_s28, %s1376_s29  ;;  %p1382_p2 = scmp.lt.s32.totalorder %s1376_s29, %s1376_s29 }
   0x7   :  { %p1383_p3 = por %p1382_p2, %p1381_p1 }
   0x9   :  { %p1384_p4 = pnand %p1383_p3, %p1377_p0 }
   0xb   :  { %1387 = shalt.err (!%p1384_p4)
}
   0xc   :  { %s1455_s30 = smov 128   ;;  %s1456_s9 = smov 8  }
   0xd   :  { %41 = dma.hbm_to_vmem [thread:$0]  %s1971_s1, 4096, %s36_s28, [#allocation7], %s1455_s30, %s1455_s30, %s1456_s9  }
   0xe   :  { %s1457_s12 = smov [#allocation3]  }
   0xf   :  { %s23_s13 = sshll.u32 %s1457_s12, 4  ;;  %s24_s13 = int_to_ptr.vmem [resolvable:$true] %s23_s13 }
  0x10   :  { %s1396_s14 = scalar_lea.vmem %s24_s13, 4096  ;;  %p1401_p6 = scmp.lt.s32.totalorder %s24_s13, %s24_s13 }
  0x11   :  { %p1397_p5 = scmp.ne.s32.totalorder %s24_s13, %s1396_s14  ;;  %p1402_p7 = scmp.lt.s32.totalorder %s1396_s14, %s1396_s14 }
  0x13   :  { %p1403_p8 = por %p1402_p7, %p1401_p6 }
  0x15   :  { %p1404_p9 = pnand %p1403_p8, %p1397_p5 }
  0x17   :  { %1407 = shalt.err (!%p1404_p9)
}
  0x18   :  { %s1458_s15 = smov 256   ;;  %s1459_s16 = smov 16  }
  0x19   :  { %29 = dma.hbm_to_vmem [thread:$0]  %s1970_s0, 4096, %s24_s13, [#allocation4], %s1458_s15, %s1458_s15, %s1459_s16  }
  0x1a   :  { %s1460_s19 = smov [#allocation8]  }
  0x1b   :  { %s49_s20 = sshll.u32 %s1460_s19, 4  ;;  %s50_s20 = int_to_ptr.vmem [resolvable:$true] %s49_s20 }
  0x1c   :  { %s1416_s1 = scalar_lea.vmem %s50_s20, 2048  ;;  %p1421_p11 = scmp.lt.s32.totalorder %s50_s20, %s50_s20 }
  0x1d   :  { %p1417_p10 = scmp.ne.s32.totalorder %s50_s20, %s1416_s1  ;;  %p1422_p12 = scmp.lt.s32.totalorder %s1416_s1, %s1416_s1 }
  0x1f   :  { %p1423_p13 = por %p1422_p12, %p1421_p11 }
  0x21   :  { %p1424_p0 = pnand %p1423_p13, %p1417_p10 }
  0x23   :  { %1427 = shalt.err (!%p1424_p0)
}
  0x24   :  { %s1461_s21 = smov 64   ;;  %s1462_s22 = smov 4  }
  0x25   :  { %55 = dma.hbm_to_vmem [thread:$0]  %s1973_s3, 2048, %s50_s20, [#allocation7], %s1461_s21, %s1461_s21, %s1462_s22  }
  0x26   :  { %1448 = dma.done.wait [#allocation4], 4096  }
  0x27   :  { %1449 = vsyncadd [#allocation4], 4294963200 }
  0x28   :  { %1450 = dma.done.wait [#allocation7], 6144  }
  0x29   :  { %1451 = vsyncadd [#allocation7], 4294961152  ;;  %v1240_v0 = vld [vmem:[#allocation6 + $0x74] ss:$8 sps:$4 sm:$0xff]   ;;  %v1242_v1 = vld [vmem:[#allocation6 + $0x70] ss:$8 sps:$4 sm:$0xff]  }
  0x2a   :  { %542 = vmatprep.subr.bf16.mxu0 %v1240_v0  ;;  %v1243_v2 = vld [vmem:[#allocation6 + $0x64] ss:$8 sps:$4 sm:$0xff]   ;;  %v1245_v3 = vld [vmem:[#allocation6 + $0x60] ss:$8 sps:$4 sm:$0xff]   ;;  %v1246_v4 = vld [vmem:[#allocation6 + $0x54] ss:$8 sps:$4 sm:$0xff]  }
  0x2b   :  { %543 = vmatpush1.bf16.msra.mxu0 %v1242_v1  ;;  %v1248_v5 = vld [vmem:[#allocation6 + $0x50] ss:$8 sps:$4 sm:$0xff]   ;;  %v1249_v6 = vld [vmem:[#allocation6 + $0x44] ss:$8 sps:$4 sm:$0xff]   ;;  %v1251_v7 = vld [vmem:[#allocation6 + $0x40] ss:$8 sps:$4 sm:$0xff]  }
  0x2c   :  { %544 = vmatprep.subr.bf16.mxu0 %v1243_v2  ;;  %v1252_v8 = vld [vmem:[#allocation6 + $0x34] ss:$8 sps:$4 sm:$0xff]   ;;  %v1254_v9 = vld [vmem:[#allocation6 + $0x30] ss:$8 sps:$4 sm:$0xff]   ;;  %v1255_v10 = vld [vmem:[#allocation6 + $0x24] ss:$8 sps:$4 sm:$0xff]  }
  0x2d   :  { %v1257_v11 = vld [vmem:[#allocation6 + $0x20] ss:$8 sps:$4 sm:$0xff]   ;;  %v1258_v12 = vld [vmem:[#allocation6 + $0x14] ss:$8 sps:$4 sm:$0xff]   ;;  %v1260_v16 = vld [vmem:[#allocation6 + $0x10] ss:$8 sps:$4 sm:$0xff]  }
  0x2e   :  { %v1521_v13 = vld [vmem:[#allocation3 + $0x8] sm:$0xff]  ;;  %v1523_v14 = vld [vmem:[#allocation3 + $0x18] sm:$0xff]  ;;  %v1290_v26 = vld [vmem:[#allocation8 + $0x70] sm:$0xff]   ;;  %vm296_vm0 = vcmask 1041409   ;;  %vm298_vm1 = vcmask 1042434   ;;  %vm300_vm2 = vcmask 1043459  }
  0x2f   :  { %545 = vmatpush1.bf16.msra.mxu0 %v1245_v3  ;;  %v323_v15 = vpack.c.bf16 %v1523_v14, %v1521_v13  ;;  %v1261_v17 = vld [vmem:[#allocation6 + $0x4] ss:$8 sps:$4 sm:$0xff]   ;;  %v1263_v18 = vld [vmem:[#allocation6] ss:$8 sps:$4 sm:$0xff]   ;;  %v1264_v19 = vld [vmem:[#allocation6 + $0xf4] ss:$8 sps:$4 sm:$0xff]  }
  0x30   :  { %546 = vmatprep.subr.bf16.mxu0 %v1246_v4  ;;  %v1266_v20 = vld [vmem:[#allocation6 + $0xf0] ss:$8 sps:$4 sm:$0xff]   ;;  %v1267_v21 = vld [vmem:[#allocation6 + $0xe4] ss:$8 sps:$4 sm:$0xff]   ;;  %v1269_v22 = vld [vmem:[#allocation6 + $0xe0] ss:$8 sps:$4 sm:$0xff]  }
  0x31   :  { %574 = vmatprep.mubr.bf16.mxu0 %v323_v15  ;;  %v1288_v23 = vld [vmem:[#allocation8 + $0x78] sm:$0xff]   ;;  %v1291_v27 = vld [vmem:[#allocation8 + $0x30] sm:$0xff]   ;;  %v1292_v28 = vld [vmem:[#allocation8 + $0x68] sm:$0xff]   ;;  %vm302_vm3 = vcmask 1044484   ;;  %vm304_vm4 = vcmask 1045509   ;;  %vm306_vm5 = vcmask 1046534  }
  0x32   :  { %v1270_v24 = vld [vmem:[#allocation6 + $0xd4] ss:$8 sps:$4 sm:$0xff]   ;;  %1166 = vmatprep.subr.bf16.mxu1 %v1288_v23  ;;  %v1272_v29 = vld [vmem:[#allocation6 + $0xd0] ss:$8 sps:$4 sm:$0xff]   ;;  %v1273_v30 = vld [vmem:[#allocation6 + $0xc4] ss:$8 sps:$4 sm:$0xff]  }
  0x33   :  { %547 = vmatpush1.bf16.msra.mxu0 %v1248_v5  ;;  %v1289_v25 = vld [vmem:[#allocation8 + $0x38] sm:$0xff]   ;;  %v1293_v31 = vld [vmem:[#allocation8 + $0x28] sm:$0xff]   ;;  %v1294_v33 = vld [vmem:[#allocation8 + $0x60] sm:$0xff]   ;;  %vm308_vm6 = vcmask 1047559   ;;  %vm319_vm7 = vcmask 64512  }
  0x34   :  { %548 = vmatprep.subr.bf16.mxu0 %v1249_v6  ;;  %1167 = vmatpush3.bf16.msra.mxu1 %v1289_v25  ;;  %v1275_v32 = vld [vmem:[#allocation6 + $0xc0] ss:$8 sps:$4 sm:$0xff]   ;;  %v1276_v34 = vld [vmem:[#allocation6 + $0xb4] ss:$8 sps:$4 sm:$0xff]   ;;  %v1278_v37 = vld [vmem:[#allocation6 + $0xb0] ss:$8 sps:$4 sm:$0xff]  }
  0x35   :  { %1168 = vmatprep.subr.bf16.mxu1 %v1290_v26  ;;  %v1295_v35 = vld [vmem:[#allocation8 + $0x20] sm:$0xff]   ;;  %v1296_v36 = vld [vmem:[#allocation8 + $0x58] sm:$0xff]   ;;  %v1529_v46 = vld [vmem:[#allocation3 + $0x10] sm:$0xff] }
  0x36   :  { %v1279_v38 = vld [vmem:[#allocation6 + $0xa4] ss:$8 sps:$4 sm:$0xff]   ;;  %v1297_v39 = vld [vmem:[#allocation8 + $0x18] sm:$0xff]   ;;  %v1281_v40 = vld [vmem:[#allocation6 + $0xa0] ss:$8 sps:$4 sm:$0xff]  }
  0x37   :  { %549 = vmatpush1.bf16.msra.mxu0 %v1251_v7  ;;  %v1282_v41 = vld [vmem:[#allocation6 + $0x94] ss:$8 sps:$4 sm:$0xff]   ;;  %v1284_v42 = vld [vmem:[#allocation6 + $0x90] ss:$8 sps:$4 sm:$0xff]   ;;  %v1285_v43 = vld [vmem:[#allocation6 + $0x84] ss:$8 sps:$4 sm:$0xff]  }
  0x38   :  { %550 = vmatprep.subr.bf16.mxu0 %v1252_v8  ;;  %1169 = vmatpush3.bf16.msra.mxu1 %v1291_v27  ;;  %v1287_v44 = vld [vmem:[#allocation6 + $0x80] ss:$8 sps:$4 sm:$0xff]   ;;  %v1533_v48 = vld [vmem:[#allocation3 + $0x38] sm:$0xff]  ;;  %v1541_v52 = vld [vmem:[#allocation3 + $0x30] sm:$0xff] }
  0x39   :  { %1170 = vmatprep.subr.bf16.mxu1 %v1292_v28  ;;  %v1527_v45 = vld [vmem:[#allocation3] sm:$0xff]  ;;  %v1531_v47 = vld [vmem:[#allocation3 + $0x28] sm:$0xff]  ;;  %v1545_v54 = vld [vmem:[#allocation3 + $0x58] sm:$0xff] }
  0x3a   :  { %v322_v49 = vpack.c.bf16 %v1529_v46, %v1527_v45  ;;  %v325_v50 = vpack.c.bf16 %v1533_v48, %v1531_v47  ;;  %v1539_v51 = vld [vmem:[#allocation3 + $0x20] sm:$0xff]  ;;  %v1543_v53 = vld [vmem:[#allocation3 + $0x48] sm:$0xff]  ;;  %v1553_v58 = vld [vmem:[#allocation3 + $0x50] sm:$0xff] }
  0x3b   :  { %551 = vmatpush1.bf16.msra.mxu0 %v1254_v9  ;;  %v324_v55 = vpack.c.bf16 %v1541_v52, %v1539_v51  ;;  %v327_v56 = vpack.c.bf16 %v1545_v54, %v1543_v53  ;;  %v1551_v57 = vld [vmem:[#allocation3 + $0x40] sm:$0xff]  ;;  %v1555_v59 = vld [vmem:[#allocation3 + $0x68] sm:$0xff]  ;;  %v1557_v60 = vld [vmem:[#allocation3 + $0x78] sm:$0xff] }
  0x3c   :  { %552 = vmatprep.subr.bf16.mxu0 %v1255_v10  ;;  %1171 = vmatpush3.bf16.msra.mxu1 %v1293_v31  ;;  %v326_v61 = vpack.c.bf16 %v1553_v58, %v1551_v57  ;;  %v329_v62 = vpack.c.bf16 %v1557_v60, %v1555_v59  ;;  %v1563_v63 = vld [vmem:[#allocation3 + $0x60] sm:$0xff]  ;;  %v1565_v0 = vld [vmem:[#allocation3 + $0x70] sm:$0xff]  ;;  %v1567_v1 = vld [vmem:[#allocation3 + $0x88] sm:$0xff] }
  0x3d   :  { %1172 = vmatprep.subr.bf16.mxu1 %v1294_v33  ;;  %v1569_v2 = vld [vmem:[#allocation3 + $0x98] sm:$0xff]  ;;  %v328_v3 = vpack.c.bf16 %v1565_v0, %v1563_v63  ;;  %v1575_v5 = vld [vmem:[#allocation3 + $0x80] sm:$0xff]  ;;  %v1577_v6 = vld [vmem:[#allocation3 + $0x90] sm:$0xff] }
  0x3e   :  { %v331_v4 = vpack.c.bf16 %v1569_v2, %v1567_v1  ;;  %v1579_v7 = vld [vmem:[#allocation3 + $0xa8] sm:$0xff]  ;;  %v1581_v8 = vld [vmem:[#allocation3 + $0xb8] sm:$0xff]  ;;  %v330_v9 = vpack.c.bf16 %v1577_v6, %v1575_v5  ;;  %v1611_v25 = vld [vmem:[#allocation3 + $0xe0] sm:$0xff] }
  0x3f   :  { %553 = vmatpush1.bf16.msra.mxu0 %v1257_v11  ;;  %v333_v10 = vpack.c.bf16 %v1581_v8, %v1579_v7  ;;  %v1587_v11 = vld [vmem:[#allocation3 + $0xa0] sm:$0xff]  ;;  %v1591_v15 = vld [vmem:[#allocation3 + $0xc8] sm:$0xff]  ;;  %v1613_v26 = vld [vmem:[#allocation3 + $0xf0] sm:$0xff] }
  0x40   :  { %554 = vmatprep.subr.bf16.mxu0 %v1258_v12  ;;  %1173 = vmatpush3.bf16.msra.mxu1 %v1295_v35  ;;  %v1589_v12 = vld [vmem:[#allocation3 + $0xb0] sm:$0xff]  ;;  %v336_v27 = vpack.c.bf16 %v1613_v26, %v1611_v25  ;;  %v1301_v31 = vld [vmem:[#allocation8 + $0x8] sm:$0xff]   ;;  %v1303_v33 = vld [vmem:[#allocation8] sm:$0xff]  }
  0x41   :  { %1174 = vmatprep.subr.bf16.mxu1 %v1296_v36  ;;  %v1298_v28 = vld [vmem:[#allocation8 + $0x50] sm:$0xff]  }
  0x43   :  { %555 = vmatpush1.bf16.msra.mxu0 %v1260_v16  ;;  %v1593_v16 = vld [vmem:[#allocation3 + $0xd8] sm:$0xff] }
  0x44   :  { %556 = vmatprep.subr.bf16.mxu0 %v1261_v17  ;;  %1175 = vmatpush3.bf16.msra.mxu1 %v1297_v39  ;;  %v332_v17 = vpack.c.bf16 %v1589_v12, %v1587_v11 }
  0x45   :  { %1176 = vmatprep.subr.bf16.mxu1 %v1298_v28 }
  0x47   :  { %557 = vmatpush1.bf16.msra.mxu0 %v1263_v18  ;;  %v335_v18 = vpack.c.bf16 %v1593_v16, %v1591_v15 }
  0x48   :  { %558 = vmatprep.subr.bf16.mxu0 %v1264_v19  ;;  %v1599_v19 = vld [vmem:[#allocation3 + $0xc0] sm:$0xff] }
  0x4b   :  { %559 = vmatpush2.bf16.msra.mxu0 %v1266_v20  ;;  %v1601_v20 = vld [vmem:[#allocation3 + $0xd0] sm:$0xff] }
  0x4c   :  { %560 = vmatprep.subr.bf16.mxu0 %v1267_v21  ;;  %v1603_v21 = vld [vmem:[#allocation3 + $0xe8] sm:$0xff]  ;;  %v334_v23 = vpack.c.bf16 %v1601_v20, %v1599_v19 }
  0x4f   :  { %561 = vmatpush2.bf16.msra.mxu0 %v1269_v22  ;;  %v1605_v22 = vld [vmem:[#allocation3 + $0xf8] sm:$0xff] }
  0x50   :  { %562 = vmatprep.subr.bf16.mxu0 %v1270_v24  ;;  %v337_v24 = vpack.c.bf16 %v1605_v22, %v1603_v21 }
  0x53   :  { %563 = vmatpush2.bf16.msra.mxu0 %v1272_v29  ;;  %v1299_v29 = vld [vmem:[#allocation8 + $0x10] sm:$0xff]  }
  0x54   :  { %564 = vmatprep.subr.bf16.mxu0 %v1273_v30  ;;  %1177 = vmatpush3.bf16.msra.mxu1 %v1299_v29  ;;  %v1300_v30 = vld [vmem:[#allocation8 + $0x48] sm:$0xff]  }
  0x55   :  { %1178 = vmatprep.subr.bf16.mxu1 %v1300_v30 }
  0x57   :  { %565 = vmatpush2.bf16.msra.mxu0 %v1275_v32  ;;  %v1302_v32 = vld [vmem:[#allocation8 + $0x40] sm:$0xff]  }
  0x58   :  { %566 = vmatprep.subr.bf16.mxu0 %v1276_v34  ;;  %1179 = vmatpush3.bf16.msra.mxu1 %v1301_v31  ;;  %v106_v34 = vlaneseq }
  0x59   :  { %1180 = vmatprep.subr.bf16.mxu1 %v1302_v32 }
  0x5a   :  { %v1618_v35 = vshrl.u32 %v106_v34, 7 }
  0x5b   :  { %567 = vmatpush2.bf16.msra.mxu0 %v1278_v37 }
  0x5c   :  { %568 = vmatprep.subr.bf16.mxu0 %v1279_v38  ;;  %1181 = vmatpush3.bf16.msra.mxu1 %v1303_v33  ;;  %v112_v36 = vsub.s32 1, %v1618_v35  ;;  %v108_v37 = vsub.s32 0, %v1618_v35  ;;  %v370_v38 = vld [vmem:[%s1972_s2] sm:$0x3] }
  0x5f   :  { %569 = vmatpush2.bf16.msra.mxu0 %v1281_v40  ;;  %v1627_v40 = vrot.slane %v370_v38, %v112_v36 }
  0x60   :  { %570 = vmatprep.subr.bf16.mxu0 %v1282_v41  ;;  %v1631_v41 = vrot.slane %v370_v38, %v108_v37 }
  0x63   :  { %571 = vmatpush2.bf16.msra.mxu0 %v1284_v42 }
  0x64   :  { %572 = vmatprep.subr.bf16.mxu0 %v1285_v43 }
  0x67   :  { %573 = vmatpush2.bf16.msra.mxu0 %v1287_v44 }
  0x6a   :  { %575 = vmatmul.mubr.bf16.vlgmr.msra.gmra.mxu0 %v322_v49 }
  0x6b   :  { %584 = vmatprep.mubr.bf16.mxu0 %v325_v50 }
  0x72   :  { %585 = vmatmul.mubr.bf16.gmra.mxu0 %v324_v55 }
  0x73   :  { %594 = vmatprep.mubr.bf16.mxu0 %v327_v56 }
  0x7a   :  { %595 = vmatmul.mubr.bf16.gmra.mxu0 %v326_v61 }
  0x7b   :  { %604 = vmatprep.mubr.bf16.mxu0 %v329_v62 }
  0x82   :  { %605 = vmatmul.mubr.bf16.gmra.mxu0 %v328_v3 }
  0x83   :  { %614 = vmatprep.mubr.bf16.mxu0 %v331_v4 }
  0x8a   :  { %615 = vmatmul.mubr.bf16.gmra.mxu0 %v330_v9 }
  0x8b   :  { %624 = vmatprep.mubr.bf16.mxu0 %v333_v10 }
  0x92   :  { %625 = vmatmul.mubr.bf16.gmra.mxu0 %v332_v17 }
  0x93   :  { %634 = vmatprep.mubr.bf16.mxu0 %v335_v18 }
  0x9a   :  { %635 = vmatmul.mubr.bf16.gmra.mxu0 %v334_v23 }
  0x9b   :  { %644 = vmatprep.mubr.bf16.mxu0 %v337_v24 }
  0xa2   :  { %645 = vmatmul.mubr.bf16.gmra.mxu0 %v336_v27 }
 0x12a   :  { %v576_v39 = vpop.f32.mrf.mxu0 }
 0x12b   :  { %v577_v50 = vadd.f32 %v576_v39, %v1631_v41 }
 0x12c   :  { %v578_v42 = vpop.f32.mrf.mxu0 }
 0x12d   :  { %v579_v44 = vadd.f32 %v578_v42, %v1627_v40  ;;  %v655_v9 = vmax.f32 %v577_v50, 0.0 }
 0x12e   :  { %v580_v43 = vpop.f32.mrf.mxu0 }
 0x12f   :  { %v581_v49 = vadd.f32 %v580_v43, %v1631_v41  ;;  %v656_v3 = vmax.f32 %v579_v44, 0.0 }
 0x130   :  { %v582_v55 = vpop.f32.mrf.mxu0 }
 0x131   :  { %v583_v56 = vadd.f32 %v582_v55, %v1627_v40  ;;  %v657_v61 = vmax.f32 %v581_v49, 0.0 }
 0x132   :  { %v586_v62 = vpop.f32.mrf.mxu0 }
 0x133   :  { %v658_v4 = vmax.f32 %v583_v56, 0.0  ;;  %v687_v18 = vpack.c.bf16 %v657_v61, %v655_v9  ;;  %v587_v28 = vadd.f32 %v586_v62, %v1631_v41 }
 0x134   :  { %v588_v10 = vpop.f32.mrf.mxu0 }
 0x135   :  { %v688_v17 = vpack.c.bf16 %v658_v4, %v656_v3  ;;  %v589_v24 = vadd.f32 %v588_v10, %v1627_v40  ;;  %v659_v39 = vmax.f32 %v587_v28, 0.0 }
 0x136   :  { %v590_v23 = vpop.f32.mrf.mxu0 }
 0x137   :  { %v591_v27 = vadd.f32 %v590_v23, %v1631_v41  ;;  %870 = vmatprep.mubr.bf16.mxu1 %v688_v17  ;;  %v660_v33 = vmax.f32 %v589_v24, 0.0 }
 0x138   :  { %v592_v29 = vpop.f32.mrf.mxu0  ;;  %871 = vmatmul.mubr.bf16.vlgmr.msra.gmra.mxu1 %v687_v18 }
 0x139   :  { %v593_v30 = vadd.f32 %v592_v29, %v1627_v40  ;;  %v661_v31 = vmax.f32 %v591_v27, 0.0 }
 0x13a   :  { %v596_v32 = vpop.f32.mrf.mxu0 }
 0x13b   :  { %v662_v38 = vmax.f32 %v593_v30, 0.0  ;;  %v689_v44 = vpack.c.bf16 %v661_v31, %v659_v39  ;;  %v597_v56 = vadd.f32 %v596_v32, %v1631_v41 }
 0x13c   :  { %v598_v42 = vpop.f32.mrf.mxu0 }
 0x13d   :  { %v690_v43 = vpack.c.bf16 %v662_v38, %v660_v33  ;;  %v599_v50 = vadd.f32 %v598_v42, %v1627_v40  ;;  %v663_v17 = vmax.f32 %v597_v56, 0.0 }
 0x13e   :  { %v600_v49 = vpop.f32.mrf.mxu0 }
 0x13f   :  { %v601_v55 = vadd.f32 %v600_v49, %v1631_v41  ;;  %878 = vmatprep.mubr.bf16.mxu1 %v690_v43  ;;  %v664_v9 = vmax.f32 %v599_v50, 0.0 }
 0x140   :  { %v602_v61 = vpop.f32.mrf.mxu0  ;;  %879 = vmatmul.mubr.bf16.gmra.mxu1 %v689_v44 }
 0x141   :  { %v603_v62 = vadd.f32 %v602_v61, %v1627_v40  ;;  %v665_v3 = vmax.f32 %v601_v55, 0.0 }
 0x142   :  { %v606_v4 = vpop.f32.mrf.mxu0 }
 0x143   :  { %v666_v10 = vmax.f32 %v603_v62, 0.0  ;;  %v691_v24 = vpack.c.bf16 %v665_v3, %v663_v17  ;;  %v607_v30 = vadd.f32 %v606_v4, %v1631_v41 }
 0x144   :  { %v608_v18 = vpop.f32.mrf.mxu0 }
 0x145   :  { %v692_v23 = vpack.c.bf16 %v666_v10, %v664_v9  ;;  %v609_v28 = vadd.f32 %v608_v18, %v1627_v40  ;;  %v667_v43 = vmax.f32 %v607_v30, 0.0 }
 0x146   :  { %v610_v27 = vpop.f32.mrf.mxu0 }
 0x147   :  { %v611_v29 = vadd.f32 %v610_v27, %v1631_v41  ;;  %886 = vmatprep.mubr.bf16.mxu1 %v692_v23  ;;  %v668_v39 = vmax.f32 %v609_v28, 0.0 }
 0x148   :  { %v612_v31 = vpop.f32.mrf.mxu0  ;;  %887 = vmatmul.mubr.bf16.gmra.mxu1 %v691_v24 }
 0x149   :  { %v613_v32 = vadd.f32 %v612_v31, %v1627_v40  ;;  %v669_v33 = vmax.f32 %v611_v29, 0.0 }
 0x14a   :  { %v616_v38 = vpop.f32.mrf.mxu0 }
 0x14b   :  { %v670_v42 = vmax.f32 %v613_v32, 0.0  ;;  %v693_v50 = vpack.c.bf16 %v669_v33, %v667_v43  ;;  %v617_v62 = vadd.f32 %v616_v38, %v1631_v41 }
 0x14c   :  { %v618_v44 = vpop.f32.mrf.mxu0 }
 0x14d   :  { %v694_v49 = vpack.c.bf16 %v670_v42, %v668_v39  ;;  %v619_v56 = vadd.f32 %v618_v44, %v1627_v40  ;;  %v671_v23 = vmax.f32 %v617_v62, 0.0 }
 0x14e   :  { %v620_v55 = vpop.f32.mrf.mxu0 }
 0x14f   :  { %v621_v61 = vadd.f32 %v620_v55, %v1631_v41  ;;  %894 = vmatprep.mubr.bf16.mxu1 %v694_v49  ;;  %v672_v17 = vmax.f32 %v619_v56, 0.0 }
 0x150   :  { %v622_v3 = vpop.f32.mrf.mxu0  ;;  %895 = vmatmul.mubr.bf16.gmra.mxu1 %v693_v50 }
 0x151   :  { %v623_v4 = vadd.f32 %v622_v3, %v1627_v40  ;;  %v673_v9 = vmax.f32 %v621_v61, 0.0 }
 0x152   :  { %v626_v10 = vpop.f32.mrf.mxu0 }
 0x153   :  { %v674_v18 = vmax.f32 %v623_v4, 0.0  ;;  %v695_v28 = vpack.c.bf16 %v673_v9, %v671_v23  ;;  %v627_v32 = vadd.f32 %v626_v10, %v1631_v41 }
 0x154   :  { %v628_v24 = vpop.f32.mrf.mxu0 }
 0x155   :  { %v696_v27 = vpack.c.bf16 %v674_v18, %v672_v17  ;;  %v629_v30 = vadd.f32 %v628_v24, %v1627_v40  ;;  %v675_v49 = vmax.f32 %v627_v32, 0.0 }
 0x156   :  { %v630_v29 = vpop.f32.mrf.mxu0 }
 0x157   :  { %v631_v31 = vadd.f32 %v630_v29, %v1631_v41  ;;  %902 = vmatprep.mubr.bf16.mxu1 %v696_v27  ;;  %v676_v43 = vmax.f32 %v629_v30, 0.0 }
 0x158   :  { %v632_v33 = vpop.f32.mrf.mxu0  ;;  %903 = vmatmul.mubr.bf16.gmra.mxu1 %v695_v28 }
 0x159   :  { %v633_v38 = vadd.f32 %v632_v33, %v1627_v40  ;;  %v677_v39 = vmax.f32 %v631_v31, 0.0 }
 0x15a   :  { %v636_v42 = vpop.f32.mrf.mxu0 }
 0x15b   :  { %v678_v44 = vmax.f32 %v633_v38, 0.0  ;;  %v697_v56 = vpack.c.bf16 %v677_v39, %v675_v49  ;;  %v637_v4 = vadd.f32 %v636_v42, %v1631_v41 }
 0x15c   :  { %v638_v50 = vpop.f32.mrf.mxu0 }
 0x15d   :  { %v698_v55 = vpack.c.bf16 %v678_v44, %v676_v43  ;;  %v639_v62 = vadd.f32 %v638_v50, %v1627_v40  ;;  %v679_v27 = vmax.f32 %v637_v4, 0.0 }
 0x15e   :  { %v640_v61 = vpop.f32.mrf.mxu0 }
 0x15f   :  { %v641_v3 = vadd.f32 %v640_v61, %v1631_v41  ;;  %910 = vmatprep.mubr.bf16.mxu1 %v698_v55  ;;  %v680_v23 = vmax.f32 %v639_v62, 0.0 }
 0x160   :  { %v642_v9 = vpop.f32.mrf.mxu0  ;;  %911 = vmatmul.mubr.bf16.gmra.mxu1 %v697_v56 }
 0x161   :  { %v643_v10 = vadd.f32 %v642_v9, %v1627_v40  ;;  %v681_v17 = vmax.f32 %v641_v3, 0.0  ;;  %v1668_v3 = vld [vmem:[%s1974_s4] ss:$0 sm:$0xff] }
 0x162   :  { %v646_v18 = vpop.f32.mrf.mxu0 }
 0x163   :  { %v682_v24 = vmax.f32 %v643_v10, 0.0  ;;  %v699_v30 = vpack.c.bf16 %v681_v17, %v679_v27  ;;  %v647_v38 = vadd.f32 %v646_v18, %v1631_v41 }
 0x164   :  { %v648_v28 = vpop.f32.mrf.mxu0 }
 0x165   :  { %v700_v29 = vpack.c.bf16 %v682_v24, %v680_v23  ;;  %v649_v32 = vadd.f32 %v648_v28, %v1627_v40  ;;  %v683_v50 = vmax.f32 %v647_v38, 0.0 }
 0x166   :  { %v650_v31 = vpop.f32.mrf.mxu0 }
 0x167   :  { %v651_v33 = vadd.f32 %v650_v31, %v1631_v41  ;;  %918 = vmatprep.mubr.bf16.mxu1 %v700_v29  ;;  %v684_v44 = vmax.f32 %v649_v32, 0.0 }
 0x168   :  { %v652_v39 = vpop.f32.mrf.mxu0  ;;  %919 = vmatmul.mubr.bf16.gmra.mxu1 %v699_v30 }
 0x169   :  { %v653_v42 = vadd.f32 %v652_v39, %v1627_v40  ;;  %v685_v43 = vmax.f32 %v651_v33, 0.0 }
 0x16b   :  { %v686_v49 = vmax.f32 %v653_v42, 0.0  ;;  %v701_v56 = vpack.c.bf16 %v685_v43, %v683_v50 }
 0x16d   :  { %v702_v55 = vpack.c.bf16 %v686_v49, %v684_v44 }
 0x16f   :  { %926 = vmatprep.mubr.bf16.mxu1 %v702_v55 }
 0x170   :  { %927 = vmatmul.mubr.bf16.gmra.mxu1 %v701_v56 }
 0x1f8   :  { %v1182_v61 = vpop.f32.mrf.mxu1 }
 0x1fa   :  { %v1183_v62 = vpop.f32.mrf.mxu1 }
 0x1fb   :  { %v1184_v41 = vadd.f32 %v1183_v62, %v1182_v61 }
 0x1fc   :  { %v1185_v4 = vpop.f32.mrf.mxu1 }
 0x1fd   :  { %v1671_v9 = vadd.f32 %v1184_v41, %v1668_v3 }
 0x1fe   :  { %v1186_v40 = vpop.f32.mrf.mxu1 }
 0x1ff   :  { %v1187_v10 = vadd.f32 %v1186_v40, %v1185_v4  ;;  %935 = vmax.xlane.f32.xlu0 %v1671_v9 }
 0x200   :  { %v1188_v17 = vpop.f32.mrf.mxu1 }
 0x201   :  { %v1675_v18 = vadd.f32 %v1187_v10, %v1668_v3 }
 0x202   :  { %v1189_v23 = vpop.f32.mrf.mxu1 }
 0x203   :  { %v1190_v24 = vadd.f32 %v1189_v23, %v1188_v17  ;;  %937 = vmax.xlane.f32.xlu0 %v1675_v18 }
 0x204   :  { %v1191_v27 = vpop.f32.mrf.mxu1 }
 0x205   :  { %v1679_v28 = vadd.f32 %v1190_v24, %v1668_v3 }
 0x206   :  { %v1192_v29 = vpop.f32.mrf.mxu1 }
 0x207   :  { %v1193_v30 = vadd.f32 %v1192_v29, %v1191_v27  ;;  %939 = vmax.xlane.f32.xlu1 %v1679_v28 }
 0x208   :  { %v1194_v31 = vpop.f32.mrf.mxu1 }
 0x209   :  { %v1683_v32 = vadd.f32 %v1193_v30, %v1668_v3 }
 0x20a   :  { %v1195_v33 = vpop.f32.mrf.mxu1 }
 0x20b   :  { %v1196_v38 = vadd.f32 %v1195_v33, %v1194_v31  ;;  %941 = vmax.xlane.f32.xlu1 %v1683_v32 }
 0x20c   :  { %v1197_v39 = vpop.f32.mrf.mxu1 }
 0x20d   :  { %v1687_v42 = vadd.f32 %v1196_v38, %v1668_v3 }
 0x20e   :  { %v1198_v43 = vpop.f32.mrf.mxu1 }
 0x20f   :  { %v1199_v44 = vadd.f32 %v1198_v43, %v1197_v39  ;;  %943 = vmax.xlane.f32.xlu0 %v1687_v42 }
 0x210   :  { %v1200_v49 = vpop.f32.mrf.mxu1 }
 0x211   :  { %v1691_v50 = vadd.f32 %v1199_v44, %v1668_v3 }
 0x212   :  { %v1201_v55 = vpop.f32.mrf.mxu1 }
 0x213   :  { %v1202_v56 = vadd.f32 %v1201_v55, %v1200_v49  ;;  %945 = vmax.xlane.f32.xlu1 %v1691_v50 }
 0x214   :  { %v1203_v61 = vpop.f32.mrf.mxu1 }
 0x215   :  { %v1695_v62 = vadd.f32 %v1202_v56, %v1668_v3 }
 0x216   :  { %v1204_v41 = vpop.f32.mrf.mxu1 }
 0x217   :  { %v1205_v4 = vadd.f32 %v1204_v41, %v1203_v61  ;;  %947 = vmax.xlane.f32.xlu0 %v1695_v62 }
 0x218   :  { %v1206_v40 = vpop.f32.mrf.mxu1 }
 0x219   :  { %v1699_v10 = vadd.f32 %v1205_v4, %v1668_v3 }
 0x21a   :  { %v1207_v17 = vpop.f32.mrf.mxu1 }
 0x21b   :  { %v1208_v23 = vadd.f32 %v1207_v17, %v1206_v40  ;;  %949 = vmax.xlane.f32.xlu1 %v1699_v10  ;;  %v104_v40 = vld [vmem:[%s1975_s5] sm:$0x3] }
 0x21c   :  { %v1209_v24 = vpop.f32.mrf.mxu1 }
 0x21d   :  { %v1703_v27 = vadd.f32 %v1208_v23, %v1668_v3 }
 0x21e   :  { %v1210_v29 = vpop.f32.mrf.mxu1 }
 0x21f   :  { %v1211_v30 = vadd.f32 %v1210_v29, %v1209_v24  ;;  %951 = vmax.xlane.f32.xlu0 %v1703_v27  ;;  %v1726_v29 = vrot.slane %v104_v40, %v112_v36 }
 0x220   :  { %v1212_v31 = vpop.f32.mrf.mxu1 }
 0x221   :  { %v1707_v33 = vadd.f32 %v1211_v30, %v1668_v3 }
 0x222   :  { %v1213_v38 = vpop.f32.mrf.mxu1 }
 0x223   :  { %v1214_v39 = vadd.f32 %v1213_v38, %v1212_v31  ;;  %953 = vmax.xlane.f32.xlu1 %v1707_v33  ;;  %v1731_v31 = vrot.slane %v104_v40, %v108_v37  ;;  %v119_v37 = vmul.f32 %v1726_v29, %v1523_v14 }
 0x224   :  { %v1215_v43 = vpop.f32.mrf.mxu1 }
 0x225   :  { %v1711_v44 = vadd.f32 %v1214_v39, %v1668_v3  ;;  %v116_v36 = vmul.f32 %v1731_v31, %v1527_v45  ;;  %v118_v40 = vmul.f32 %v1731_v31, %v1529_v46  ;;  %v133_v45 = vmul.f32 %v1726_v29, %v1567_v1 }
 0x226   :  { %v1216_v49 = vpop.f32.mrf.mxu1  ;;  %v134_v14 = vmul.f32 %v1731_v31, %v1577_v6  ;;  %v135_v46 = vmul.f32 %v1726_v29, %v1569_v2  ;;  %v121_v1 = vmul.f32 %v1726_v29, %v1531_v47  ;;  %v137_v6 = vmul.f32 %v1726_v29, %v1579_v7 }
 0x227   :  { %v1217_v55 = vadd.f32 %v1216_v49, %v1215_v43  ;;  %955 = vmax.xlane.f32.xlu0 %v1711_v44  ;;  %v117_v49 = vmul.f32 %v1726_v29, %v1521_v13  ;;  %v138_v47 = vmul.f32 %v1731_v31, %v1589_v12  ;;  %v124_v7 = vmul.f32 %v1731_v31, %v1551_v57 }
 0x228   :  { %v1218_v56 = vpop.f32.mrf.mxu1  ;;  %v141_v12 = vmul.f32 %v1726_v29, %v1591_v15 }
 0x229   :  { %v1715_v61 = vadd.f32 %v1217_v55, %v1668_v3  ;;  %v148_v13 = vadd.f32 %v117_v49, %v116_v36  ;;  %v175_v49 = vadd.f32 %v135_v46, %v134_v14  ;;  %v123_v36 = vmul.f32 %v1726_v29, %v1533_v48 }
 0x22a   :  { %v1219_v41 = vpop.f32.mrf.mxu1 }
 0x22b   :  { %v1220_v4 = vadd.f32 %v1219_v41, %v1218_v56  ;;  %957 = vmax.xlane.f32.xlu1 %v1715_v61 }
 0x22c   :  { %v1221_v17 = vpop.f32.mrf.mxu1 }
 0x22d   :  { %v1722_v23 = vadd.f32 %v1220_v4, %v1668_v3 }
 0x22e   :  { %v1222_v24 = vpop.f32.mrf.mxu1 }
 0x22f   :  { %v1223_v30 = vadd.f32 %v1222_v24, %v1221_v17  ;;  %959 = vmax.xlane.f32.xlu0 %v1722_v23  ;;  %v132_v24 = vmul.f32 %v1731_v31, %v1575_v5  ;;  %v120_v5 = vmul.f32 %v1731_v31, %v1539_v51 }
 0x230   :  { %v1224_v38 = vpop.f32.mrf.mxu1 }
 0x231   :  { %v1734_v39 = vadd.f32 %v1223_v30, %v1668_v3  ;;  %v154_v2 = vadd.f32 %v121_v1, %v120_v5 }
 0x232   :  { %v1225_v43 = vpop.f32.mrf.mxu1 }
 0x233   :  { %v1226_v55 = vadd.f32 %v1225_v43, %v1224_v38  ;;  %961 = vmax.xlane.f32.xlu1 %v1734_v39  ;;  %v151_v38 = vadd.f32 %v119_v37, %v118_v40  ;;  %v172_v43 = vadd.f32 %v133_v45, %v132_v24  ;;  %v125_v37 = vmul.f32 %v1726_v29, %v1543_v53 }
 0x234   :  { %v1227_v56 = vpop.f32.mrf.mxu1 }
 0x235   :  { %v1742_v41 = vadd.f32 %v1226_v55, %v1668_v3  ;;  %v122_v55 = vmul.f32 %v1731_v31, %v1541_v52  ;;  %v160_v48 = vadd.f32 %v125_v37, %v124_v7 }
 0x236   :  { %v1228_v4 = vpop.f32.mrf.mxu1 }
 0x237   :  { %v1229_v17 = vadd.f32 %v1228_v4, %v1227_v56  ;;  %963 = vmax.xlane.f32.xlu0 %v1742_v41  ;;  %v139_v56 = vmul.f32 %v1726_v29, %v1581_v8  ;;  %v140_v4 = vmul.f32 %v1731_v31, %v1599_v19 }
 0x239   :  { %v1754_v30 = vadd.f32 %v1229_v17, %v1668_v3  ;;  %v136_v3 = vmul.f32 %v1731_v31, %v1587_v11  ;;  %v157_v11 = vadd.f32 %v123_v36, %v122_v55  ;;  %v181_v52 = vadd.f32 %v139_v56, %v138_v47 }
 0x23a   :  { %v184_v8 = vadd.f32 %v141_v12, %v140_v4 }
 0x23b   :  { %965 = vmax.xlane.f32.xlu1 %v1754_v30  ;;  %149 = vadd.xlane.f32.xlu0 %v148_v13  ;;  %v178_v51 = vadd.f32 %v137_v6, %v136_v3 }
 0x23f   :  { %152 = vadd.xlane.f32.xlu1 %v151_v38  ;;  %173 = vadd.xlane.f32.xlu0 %v172_v43 }
 0x243   :  { %176 = vadd.xlane.f32.xlu1 %v175_v49  ;;  %155 = vadd.xlane.f32.xlu0 %v154_v2 }
 0x247   :  { %179 = vadd.xlane.f32.xlu1 %v178_v51  ;;  %158 = vadd.xlane.f32.xlu0 %v157_v11 }
 0x24b   :  { %182 = vadd.xlane.f32.xlu1 %v181_v52  ;;  %161 = vadd.xlane.f32.xlu0 %v160_v48 }
 0x24f   :  { %185 = vadd.xlane.f32.xlu1 %v184_v8 }
 0x288   :  { %v936_v40 = vpop.xlane.xlu0 %935 }
 0x289   :  { %v967_v57 = vsub.f32 %v1671_v9, %v936_v40 }
 0x28b   :  { %v983_v17 = vmul.f32 1.442695, %v967_v57 }
 0x28c   :  { %v938_v13 = vpop.xlane.xlu0 %937 }
 0x28d   :  { %1304 = vpow2.f32 %v983_v17  ;;  %v968_v53 = vsub.f32 %v1675_v18, %v938_v13 }
 0x28f   :  { %v985_v24 = vmul.f32 1.442695, %v968_v53 }
 0x290   :  { %v940_v45 = vpop.xlane.xlu1 %939 }
 0x291   :  { %1306 = vpow2.f32 %v985_v24  ;;  %v969_v19 = vsub.f32 %v1679_v28, %v940_v45 }
 0x293   :  { %v987_v38 = vmul.f32 1.442695, %v969_v19 }
 0x294   :  { %v942_v14 = vpop.xlane.xlu1 %941 }
 0x295   :  { %1308 = vpow2.f32 %v987_v38  ;;  %v970_v15 = vsub.f32 %v1683_v32, %v942_v14 }
 0x297   :  { %v989_v46 = vmul.f32 1.442695, %v970_v15 }
 0x298   :  { %v944_v43 = vpop.xlane.xlu0 %943 }
 0x299   :  { %1310 = vpow2.f32 %v989_v46  ;;  %v971_v9 = vsub.f32 %v1687_v42, %v944_v43  ;;  %v1836_v46 = vstv %s1976_s6  ;;  %s1463_s6 = smov [#allocation9]  }
 0x29a   :  { %v1790_v5 = vpop.eup %1304  ;;  %s1100_s28 = sshll.u32 %s1463_s6, 4  ;;  %s1101_s28 = int_to_ptr.vmem [resolvable:$true] %s1100_s28 }
 0x29b   :  { %v991_v1 = vmul.f32 1.442695, %v971_v9  ;;  %1015 = vadd.xlane.f32.xlu0 %v1790_v5  ;;  %s1428_s13 = scalar_lea.vmem %s1101_s28, 2048  ;;  %p1433_p2 = scmp.lt.s32.totalorder %s1101_s28, %s1101_s28 }
 0x29c   :  { %v946_v18 = vpop.xlane.xlu1 %945  ;;  %p1429_p1 = scmp.ne.s32.totalorder %s1101_s28, %s1428_s13  ;;  %p1434_p3 = scmp.lt.s32.totalorder %s1428_s13, %s1428_s13 }
 0x29d   :  { %1312 = vpow2.f32 %v991_v1  ;;  %v972_v49 = vsub.f32 %v1691_v50, %v946_v18 }
 0x29e   :  { %v1794_v28 = vpop.eup %1306  ;;  %p1435_p4 = por %p1434_p3, %p1433_p2 }
 0x29f   :  { %v993_v3 = vmul.f32 1.442695, %v972_v49  ;;  %1017 = vadd.xlane.f32.xlu1 %v1794_v28 }
 0x2a0   :  { %v948_v32 = vpop.xlane.xlu0 %947  ;;  %p1436_p5 = pnand %p1435_p4, %p1429_p1 }
 0x2a1   :  { %1314 = vpow2.f32 %v993_v3  ;;  %v973_v6 = vsub.f32 %v1695_v62, %v948_v32 }
 0x2a2   :  { %v1798_v2 = vpop.eup %1308 }
 0x2a3   :  { %v995_v42 = vmul.f32 1.442695, %v973_v6  ;;  %1019 = vadd.xlane.f32.xlu0 %v1798_v2 }
 0x2a4   :  { %v950_v55 = vpop.xlane.xlu1 %949 }
 0x2a5   :  { %1316 = vpow2.f32 %v995_v42  ;;  %v974_v36 = vsub.f32 %v1699_v10, %v950_v55 }
 0x2a6   :  { %v1802_v51 = vpop.eup %1310 }
 0x2a7   :  { %v997_v50 = vmul.f32 1.442695, %v974_v36  ;;  %1021 = vadd.xlane.f32.xlu1 %v1802_v51 }
 0x2a8   :  { %v952_v47 = vpop.xlane.xlu0 %951 }
 0x2a9   :  { %1318 = vpow2.f32 %v997_v50  ;;  %v975_v56 = vsub.f32 %v1703_v27, %v952_v47 }
 0x2aa   :  { %v1806_v11 = vpop.eup %1312 }
 0x2ab   :  { %v999_v62 = vmul.f32 1.442695, %v975_v56  ;;  %1023 = vadd.xlane.f32.xlu0 %v1806_v11 }
 0x2ac   :  { %v954_v7 = vpop.xlane.xlu1 %953 }
 0x2ad   :  { %1320 = vpow2.f32 %v999_v62  ;;  %v976_v37 = vsub.f32 %v1707_v33, %v954_v7 }
 0x2ae   :  { %v1810_v52 = vpop.eup %1314 }
 0x2af   :  { %v1001_v10 = vmul.f32 1.442695, %v976_v37  ;;  %1025 = vadd.xlane.f32.xlu1 %v1810_v52 }
 0x2b0   :  { %v956_v48 = vpop.xlane.xlu0 %955 }
 0x2b1   :  { %1322 = vpow2.f32 %v1001_v10  ;;  %v977_v4 = vsub.f32 %v1711_v44, %v956_v48  ;;  %v126_v10 = vmul.f32 %v1731_v31, %v1553_v58  ;;  %v127_v48 = vmul.f32 %v1726_v29, %v1545_v54 }
 0x2b2   :  { %v1814_v12 = vpop.eup %1316  ;;  %v143_v54 = vmul.f32 %v1726_v29, %v1593_v16 }
 0x2b3   :  { %v1003_v27 = vmul.f32 1.442695, %v977_v4  ;;  %1027 = vadd.xlane.f32.xlu0 %v1814_v12 }
 0x2b4   :  { %v958_v8 = vpop.xlane.xlu1 %957 }
 0x2b5   :  { %1324 = vpow2.f32 %v1003_v27  ;;  %v978_v40 = vsub.f32 %v1715_v61, %v958_v8  ;;  %v142_v8 = vmul.f32 %v1731_v31, %v1601_v20  ;;  %v129_v20 = vmul.f32 %v1726_v29, %v1555_v59 }
 0x2b6   :  { %v1818_v57 = vpop.eup %1318 }
 0x2b7   :  { %v1005_v33 = vmul.f32 1.442695, %v978_v40  ;;  %1029 = vadd.xlane.f32.xlu1 %v1818_v57 }
 0x2b8   :  { %v960_v17 = vpop.xlane.xlu0 %959 }
 0x2b9   :  { %1326 = vpow2.f32 %v1005_v33  ;;  %v979_v13 = vsub.f32 %v1722_v23, %v960_v17  ;;  %v231_v23 = vand.u32 127, %v106_v34 }
 0x2ba   :  { %v1822_v53 = vpop.eup %1320 }
 0x2bb   :  { %v1007_v44 = vmul.f32 1.442695, %v979_v13  ;;  %1031 = vadd.xlane.f32.xlu0 %v1822_v53  ;;  %v1841_v18 = vsub.s32 %v231_v23, %v1618_v35 }
 0x2bc   :  { %v962_v24 = vpop.xlane.xlu1 %961 }
 0x2bd   :  { %1328 = vpow2.f32 %v1007_v44  ;;  %v980_v45 = vsub.f32 %v1734_v39, %v962_v24 }
 0x2be   :  { %v1826_v19 = vpop.eup %1322 }
 0x2bf   :  { %v1009_v61 = vmul.f32 1.442695, %v980_v45  ;;  %1033 = vadd.xlane.f32.xlu1 %v1826_v19  ;;  %v128_v45 = vmul.f32 %v1731_v31, %v1563_v63 }
 0x2c0   :  { %v964_v38 = vpop.xlane.xlu0 %963 }
 0x2c1   :  { %1330 = vpow2.f32 %v1009_v61  ;;  %v981_v14 = vsub.f32 %v1742_v41, %v964_v38  ;;  %v163_v61 = vadd.f32 %v127_v48, %v126_v10  ;;  %v166_v59 = vadd.f32 %v129_v20, %v128_v45 }
 0x2c2   :  { %v1831_v15 = vpop.eup %1324 }
 0x2c3   :  { %v1011_v43 = vmul.f32 1.442695, %v981_v14  ;;  %1035 = vadd.xlane.f32.xlu0 %v1831_v15 }
 0x2c4   :  { %v966_v39 = vpop.xlane.xlu1 %965  ;;  %v150_v9 = vpop.xlane.xlu0 %149 }
 0x2c5   :  { %1332 = vpow2.f32 %v1011_v43  ;;  %v982_v1 = vsub.f32 %v1754_v30, %v966_v39  ;;  %v198_v34 = vadd.f32 %v1836_v46, %v150_v9  ;;  %v187_v9 = vadd.f32 %v143_v54, %v142_v8 }
 0x2c6   :  { %v1844_v41 = vpop.eup %1326 }
 0x2c7   :  { %v1013_v49 = vmul.f32 1.442695, %v982_v1  ;;  %1037 = vadd.xlane.f32.xlu1 %v1844_v41  ;;  %v235_v6 = vrot.slane %v198_v34, %v1841_v18  ;;  %v144_v1 = vmul.f32 %v1731_v31, %v1611_v25  ;;  %v145_v34 = vmul.f32 %v1726_v29, %v1603_v21 }
 0x2c8   :  { %v153_v3 = vpop.xlane.xlu1 %152  ;;  %v174_v32 = vpop.xlane.xlu0 %173  ;;  %v146_v21 = vmul.f32 %v1731_v31, %v1613_v26 }
 0x2c9   :  { %1334 = vpow2.f32 %v1013_v49  ;;  %v199_v42 = vadd.f32 %v1836_v46, %v153_v3  ;;  %v206_v55 = vadd.f32 %v1836_v46, %v174_v32  ;;  %v130_v49 = vmul.f32 %v1731_v31, %v1565_v0 }
 0x2ca   :  { %v1850_v30 = vpop.eup %1328  ;;  %v131_v3 = vmul.f32 %v1726_v29, %v1557_v60 }
 0x2cb   :  { %1039 = vadd.xlane.f32.xlu0 %v1850_v30  ;;  %v239_v35 = vrot.slane %v199_v42, %v1841_v18  ;;  %v267_v56 = vrot.slane %v206_v55, %v1841_v18  ;;  %v190_v42 = vadd.f32 %v145_v34, %v144_v1  ;;  %v147_v55 = vmul.f32 %v1726_v29, %v1605_v22 }
 0x2cc   :  { %v177_v36 = vpop.xlane.xlu1 %176  ;;  %v156_v50 = vpop.xlane.xlu0 %155  ;;  %v169_v25 = vadd.f32 %v131_v3, %v130_v49 }
 0x2cd   :  { %v297_v47 = vsel %vm296_vm0, %v239_v35, %v235_v6  ;;  %v207_v62 = vadd.f32 %v1836_v46, %v177_v36  ;;  %v200_v7 = vadd.f32 %v1836_v46, %v156_v50  ;;  %v193_v0 = vadd.f32 %v147_v55, %v146_v21 }
 0x2ce   :  { %v1858_v37 = vpop.eup %1330 }
 0x2cf   :  { %1041 = vadd.xlane.f32.xlu1 %v1858_v37  ;;  %v271_v4 = vrot.slane %v207_v62, %v1841_v18  ;;  %v243_v27 = vrot.slane %v200_v7, %v1841_v18 }
 0x2d0   :  { %v180_v40 = vpop.xlane.xlu1 %179  ;;  %v159_v33 = vpop.xlane.xlu0 %158 }
 0x2d1   :  { %v310_v17 = vsel %vm296_vm0, %v271_v4, %v267_v56  ;;  %v299_v13 = vsel %vm298_vm1, %v243_v27, %v297_v47  ;;  %v208_v44 = vadd.f32 %v1836_v46, %v180_v40  ;;  %v201_v58 = vadd.f32 %v1836_v46, %v159_v33 }
 0x2d2   :  { %v1873_v24 = vpop.eup %1332 }
 0x2d3   :  { %1043 = vadd.xlane.f32.xlu0 %v1873_v24  ;;  %v275_v38 = vrot.slane %v208_v44, %v1841_v18  ;;  %v247_v14 = vrot.slane %v201_v58, %v1841_v18 }
 0x2d4   :  { %v183_v23 = vpop.xlane.xlu1 %182  ;;  %v1908_v60 = vpop.xlane.xlu0 %161 }
 0x2d5   :  { %v311_v43 = vsel %vm298_vm1, %v275_v38, %v310_v17  ;;  %v1886_v39 = vsel %vm300_vm2, %v247_v14, %v299_v13  ;;  %v209_v16 = vadd.f32 %v1836_v46, %v183_v23 }
 0x2d6   :  { %v1889_v63 = vpop.eup %1334 }
 0x2d7   :  { %1045 = vadd.xlane.f32.xlu1 %v1889_v63  ;;  %164 = vadd.xlane.f32.xlu0 %v163_v61  ;;  %v279_v32 = vrot.slane %v209_v16, %v1841_v18 }
 0x2d8   :  { %v1910_v35 = vpop.xlane.xlu1 %185 }
 0x2d9   :  { %v1902_v6 = vsel %vm300_vm2, %v279_v32, %v311_v43 }
 0x2db   :  { %188 = vadd.xlane.f32.xlu1 %v187_v9  ;;  %167 = vadd.xlane.f32.xlu0 %v166_v59 }
 0x2df   :  { %191 = vadd.xlane.f32.xlu1 %v190_v42  ;;  %170 = vadd.xlane.f32.xlu0 %v169_v25  ;;  %v210_v25 = vadd.f32 %v1836_v46, %v1910_v35 }
 0x2e3   :  { %194 = vadd.xlane.f32.xlu1 %v193_v0 }
 0x324   :  { %v1016_v36 = vpop.xlane.xlu0 %1015 }
 0x325   :  { %1336 = vrcp.f32 %v1016_v36 }
 0x328   :  { %v1018_v50 = vpop.xlane.xlu1 %1017 }
 0x329   :  { %1338 = vrcp.f32 %v1018_v50 }
 0x32c   :  { %v1020_v47 = vpop.xlane.xlu0 %1019 }
 0x32d   :  { %1340 = vrcp.f32 %v1020_v47 }
 0x330   :  { %v1022_v56 = vpop.xlane.xlu1 %1021 }
 0x331   :  { %1342 = vrcp.f32 %v1022_v56 }
 0x332   :  { %v1337_v26 = vpop.eup %1336 }
 0x333   :  { %v1063_v31 = vmul.f32 %v1337_v26, %v1790_v5 }
 0x334   :  { %v1024_v22 = vpop.xlane.xlu0 %1023 }
 0x335   :  { %1079 = vst [vmem:[#allocation9] sm:$0xff] %v1063_v31  ;;  %1344 = vrcp.f32 %v1024_v22 }
 0x336   :  { %v1339_v29 = vpop.eup %1338 }
 0x337   :  { %v1064_v62 = vmul.f32 %v1339_v29, %v1794_v28 }
 0x338   :  { %v1026_v7 = vpop.xlane.xlu1 %1025 }
 0x339   :  { %1080 = vst [vmem:[#allocation9 + $0x8] sm:$0xff] %v1064_v62  ;;  %1346 = vrcp.f32 %v1026_v7 }
 0x33a   :  { %v1341_v10 = vpop.eup %1340 }
 0x33b   :  { %v1065_v48 = vmul.f32 %v1341_v10, %v1798_v2 }
 0x33c   :  { %v1028_v4 = vpop.xlane.xlu0 %1027 }
 0x33d   :  { %1081 = vst [vmem:[#allocation9 + $0x10] sm:$0xff] %v1065_v48  ;;  %1348 = vrcp.f32 %v1028_v4 }
 0x33e   :  { %v1343_v27 = vpop.eup %1342 }
 0x33f   :  { %v1066_v8 = vmul.f32 %v1343_v27, %v1802_v51 }
 0x340   :  { %v1030_v40 = vpop.xlane.xlu1 %1029 }
 0x341   :  { %1082 = vst [vmem:[#allocation9 + $0x18] sm:$0xff] %v1066_v8  ;;  %1350 = vrcp.f32 %v1030_v40 }
 0x342   :  { %v1345_v5 = vpop.eup %1344 }
 0x343   :  { %v1067_v33 = vmul.f32 %v1345_v5, %v1806_v11 }
 0x344   :  { %v1032_v17 = vpop.xlane.xlu0 %1031 }
 0x345   :  { %1083 = vst [vmem:[#allocation9 + $0x20] sm:$0xff] %v1067_v33  ;;  %1352 = vrcp.f32 %v1032_v17 }
 0x346   :  { %v1347_v28 = vpop.eup %1346 }
 0x347   :  { %v1068_v13 = vmul.f32 %v1347_v28, %v1810_v52 }
 0x348   :  { %v1034_v44 = vpop.xlane.xlu1 %1033 }
 0x349   :  { %1084 = vst [vmem:[#allocation9 + $0x28] sm:$0xff] %v1068_v13  ;;  %1354 = vrcp.f32 %v1034_v44 }
 0x34a   :  { %v1349_v2 = vpop.eup %1348 }
 0x34b   :  { %v1069_v58 = vmul.f32 %v1349_v2, %v1814_v12 }
 0x34c   :  { %v1036_v54 = vpop.xlane.xlu0 %1035 }
 0x34d   :  { %1085 = vst [vmem:[#allocation9 + $0x30] sm:$0xff] %v1069_v58  ;;  %1356 = vrcp.f32 %v1036_v54 }
 0x34e   :  { %v1351_v51 = vpop.eup %1350 }
 0x34f   :  { %v1070_v45 = vmul.f32 %v1351_v51, %v1818_v57 }
 0x350   :  { %v1038_v20 = vpop.xlane.xlu1 %1037 }
 0x351   :  { %1086 = vst [vmem:[#allocation9 + $0x38] sm:$0xff] %v1070_v45  ;;  %1358 = vrcp.f32 %v1038_v20 }
 0x352   :  { %v1353_v11 = vpop.eup %1352 }
 0x353   :  { %v1071_v61 = vmul.f32 %v1353_v11, %v1822_v53 }
 0x354   :  { %v1040_v38 = vpop.xlane.xlu0 %1039 }
 0x355   :  { %1087 = vst [vmem:[#allocation9 + $0x40] sm:$0xff] %v1071_v61  ;;  %1360 = vrcp.f32 %v1040_v38 }
 0x356   :  { %v1355_v52 = vpop.eup %1354 }
 0x357   :  { %v1072_v14 = vmul.f32 %v1355_v52, %v1826_v19  ;;  %v202_v19 = vadd.f32 %v1836_v46, %v1908_v60 }
 0x358   :  { %v1042_v23 = vpop.xlane.xlu1 %1041 }
 0x359   :  { %1088 = vst [vmem:[#allocation9 + $0x48] sm:$0xff] %v1072_v14  ;;  %1362 = vrcp.f32 %v1042_v23 }
 0x35a   :  { %v1357_v12 = vpop.eup %1356 }
 0x35b   :  { %v1073_v43 = vmul.f32 %v1357_v12, %v1831_v15 }
 0x35c   :  { %v1044_v16 = vpop.xlane.xlu0 %1043 }
 0x35d   :  { %1089 = vst [vmem:[#allocation9 + $0x50] sm:$0xff] %v1073_v43  ;;  %1364 = vrcp.f32 %v1044_v16 }
 0x35e   :  { %v1359_v57 = vpop.eup %1358 }
 0x35f   :  { %v1074_v9 = vmul.f32 %v1359_v57, %v1844_v41  ;;  %v251_v41 = vrot.slane %v202_v19, %v1841_v18 }
 0x360   :  { %v1046_v59 = vpop.xlane.xlu1 %1045  ;;  %v165_v53 = vpop.xlane.xlu0 %164 }
 0x361   :  { %1090 = vst [vmem:[#allocation9 + $0x58] sm:$0xff] %v1074_v9  ;;  %1366 = vrcp.f32 %v1046_v59  ;;  %v203_v49 = vadd.f32 %v1836_v46, %v165_v53  ;;  %v303_v35 = vsel %vm302_vm3, %v251_v41, %v1886_v39 }
 0x362   :  { %v1361_v1 = vpop.eup %1360 }
 0x363   :  { %v1075_v34 = vmul.f32 %v1361_v1, %v1850_v30  ;;  %v255_v55 = vrot.slane %v203_v49, %v1841_v18 }
 0x364   :  { %v189_v3 = vpop.xlane.xlu1 %188  ;;  %v168_v15 = vpop.xlane.xlu0 %167 }
 0x365   :  { %1091 = vst [vmem:[#allocation9 + $0x60] sm:$0xff] %v1075_v34  ;;  %v204_v32 = vadd.f32 %v1836_v46, %v168_v15  ;;  %v211_v30 = vadd.f32 %v1836_v46, %v189_v3  ;;  %v305_v31 = vsel %vm304_vm4, %v255_v55, %v303_v35 }
 0x366   :  { %v1363_v42 = vpop.eup %1362 }
 0x367   :  { %v1076_v21 = vmul.f32 %v1363_v42, %v1858_v37  ;;  %v259_v0 = vrot.slane %v204_v32, %v1841_v18  ;;  %v283_v37 = vrot.slane %v210_v25, %v1841_v18  ;;  %v287_v22 = vrot.slane %v211_v30, %v1841_v18 }
 0x368   :  { %v192_v60 = vpop.xlane.xlu1 %191  ;;  %v171_v36 = vpop.xlane.xlu0 %170 }
 0x369   :  { %1092 = vst [vmem:[#allocation9 + $0x68] sm:$0xff] %v1076_v21  ;;  %v212_v50 = vadd.f32 %v1836_v46, %v192_v60  ;;  %v205_v47 = vadd.f32 %v1836_v46, %v171_v36  ;;  %v307_v62 = vsel %vm306_vm5, %v259_v0, %v305_v31 }
 0x36a   :  { %v1365_v56 = vpop.eup %1364 }
 0x36b   :  { %v1077_v26 = vmul.f32 %v1365_v56, %v1873_v24  ;;  %v263_v29 = vrot.slane %v205_v47, %v1841_v18  ;;  %v291_v7 = vrot.slane %v212_v50, %v1841_v18  ;;  %v313_v24 = vsel %vm302_vm3, %v283_v37, %v1902_v6 }
 0x36c   :  { %v195_v10 = vpop.xlane.xlu1 %194  ;;  %v314_v8 = vsel %vm304_vm4, %v287_v22, %v313_v24 }
 0x36d   :  { %1093 = vst [vmem:[#allocation9 + $0x70] sm:$0xff] %v1077_v26  ;;  %v309_v39 = vsel %vm308_vm6, %v263_v29, %v307_v62  ;;  %v213_v48 = vadd.f32 %v1836_v46, %v195_v10  ;;  %v315_v5 = vsel %vm306_vm5, %v291_v7, %v314_v8 }
 0x36e   :  { %v1367_v4 = vpop.eup %1366  ;;  %320 = vst.msk [vmem:[%s1978_s8] sm:$0xff] %vm319_vm7, %v309_v39 }
 0x36f   :  { %v1078_v27 = vmul.f32 %v1367_v4, %v1889_v63  ;;  %v295_v40 = vrot.slane %v213_v48, %v1841_v18 }
 0x371   :  { %1094 = vst [vmem:[#allocation9 + $0x78] sm:$0xff] %v1078_v27  ;;  %v316_v46 = vsel %vm308_vm6, %v295_v40, %v315_v5 }
 0x372   :  { %321 = vst.msk [vmem:[%s1978_s8 + $0x8] sm:$0xff] %vm319_vm7, %v316_v46 }
 0x373   :  { %1439 = shalt.err (!%p1436_p5)
}
 0x374   :  { %1106 = dma.vmem_to_hbm [thread:$0]  %s1101_s28, 2048, %s1977_s7, [#allocation5], %s1455_s30, %s1455_s30, %s1456_s9  }
 0x375   :  { %1452 = dma.done.wait [#allocation5], 2048  }
 0x376   :  { %1453 = vsyncadd [#allocation5], 4294965248 }
 0x377   :  { %1114 = vsyncpa [#allocation4], 1 }
 0x378   :  { %1115 = vsyncpa [#allocation7], 1 }
 0x379   :  { %1116 = vsyncpa [#allocation5], 1 }

</bundles_post_ra>
